<compile_context>
chip_gen: v5e
topology: v5e:2x2
jax: 0.10.0
libtpu: 0.0.40
codegen_flags: <defaults>
</compile_context>

<pallas_src>
import math

import jax
import jax.numpy as jnp
from jax.experimental import pallas as pl
from jax.experimental.pallas import tpu as pltpu


# ---------------------------------------------------------------------------
# Generation-aware VMEM budgets
# ---------------------------------------------------------------------------

def _vmem_capacity_bytes():
    try:
        info = pltpu.get_tpu_info()
        cap = getattr(info, "vmem_capacity_bytes", None)
        if cap:
            return int(cap)
    except Exception:
        pass
    return 64 * 1024 * 1024  # conservative (v7x per-TensorCore)


_VMEM_CAP = _vmem_capacity_bytes()
if _VMEM_CAP >= 96 * 1024 * 1024:
    # v5e / v6e: 128 MiB VMEM -> big tiles amortize per-step overhead & HBM BW.
    _VMEM_STEP_BUDGET = 24 * 1024 * 1024
    _VMEM_LIMIT_BYTES = 80 * 1024 * 1024
else:
    # v7x: 64 MiB physical -> keep headroom for double-buffering.
    _VMEM_STEP_BUDGET = 10 * 1024 * 1024
    _VMEM_LIMIT_BYTES = 48 * 1024 * 1024


# ---------------------------------------------------------------------------
# Tile-size heuristics (all (8,128)-padding aware)
# ---------------------------------------------------------------------------

def _round_up(x, m):
    return ((x + m - 1) // m) * m


def _padded_bytes(shape, itemsize):
    """Real VMEM footprint of a tile: lane dim -> 128, sublane dim -> 8*(4/B)."""
    shape = tuple(int(s) for s in shape)
    if not shape:
        return itemsize
    lane = _round_up(shape[-1], 128)
    if len(shape) == 1:
        return lane * itemsize
    sub_mult = 8 * max(1, 4 // itemsize)
    sub = _round_up(shape[-2], sub_mult)
    lead = 1
    for s in shape[:-2]:
        lead *= s
    return lead * sub * lane * itemsize


def _pick_k_tile(in_dim, budget):
    """K tile: multiple of 128 that divides in_dim; else the full reduction."""
    cands = (2048, 1024, 512, 256, 128) if budget >= 16 * 1024 * 1024 \
        else (1024, 512, 256, 128)
    for cand in cands:
        if in_dim > cand and in_dim % cand == 0:
            return cand
    return in_dim


def _pick_batch_tile(batch, max_tile=512):
    """Batch (M) tile: divisor of batch, multiple of 8, <= max_tile; else full."""
    if batch <= max_tile:
        return batch
    best = None
    for c in range(8, max_tile + 1, 8):
        if batch % c == 0:
            best = c
    return best if best is not None else batch


def _pick_net_block(n_nets, batch, out_dim, tk, itemsize, budget,
                    shared_x=False, needs_scratch=True, want_parallel=2):
    """Nets per grid step, bounded by the padded VMEM budget (no hard cap)."""
    def fits(c):
        x_mult = 1 if shared_x else c
        x_b = x_mult * _padded_bytes((batch, tk), itemsize)
        w_b = c * _padded_bytes((tk, out_dim), itemsize)
        b_b = c * _padded_bytes((1, out_dim), itemsize)
        o_b = c * _padded_bytes((batch, out_dim), itemsize)
        acc_b = (c * _padded_bytes((batch, out_dim), 4)) if needs_scratch else 0
        return 2 * (x_b + w_b + b_b + o_b) + acc_b <= budget

    divisors = [c for c in range(1, n_nets + 1) if n_nets % c == 0]
    fitting = [c for c in divisors if fits(c)]
    if not fitting:
        return 1
    # Prefer >= 2 steps on the parallel axis (keeps both v7x TensorCores busy).
    multi = [c for c in fitting if n_nets // c >= want_parallel]
    return max(multi) if multi else max(fitting)


def _pick_no_tile(no_total, batch_tile, tk, itemsize, budget,
                  needs_scratch=True, want_parallel=2):
    """Lane tile over the fused N*out_dim axis (2-D small-out_dim case)."""
    cands = [c for c in range(128, no_total, 128) if no_total % c == 0]
    cands.append(no_total)

    def fits(c):
        x_b = _padded_bytes((batch_tile, tk), itemsize)
        w_b = _padded_bytes((tk, c), itemsize)
        b_b = _padded_bytes((1, c), itemsize)
        o_b = _padded_bytes((batch_tile, c), itemsize)
        acc_b = _padded_bytes((batch_tile, c), 4) if needs_scratch else 0
        return 2 * (x_b + w_b + b_b + o_b) + acc_b <= budget

    fitting = [c for c in cands if fits(c)]
    if not fitting:
        return cands[0]  # smallest legal tile
    multi = [c for c in fitting if no_total // c >= want_parallel]
    return max(multi) if multi else max(fitting)


# ---------------------------------------------------------------------------
# Kernels (factory parameterized by the contraction and the K grid axis)
# ---------------------------------------------------------------------------

def _contract_fused(x, w):
    # x: (tB, tK), w: (tK, tNO) -> (tB, tNO)
    return jnp.dot(x, w, preferred_element_type=jnp.float32)


def _contract_per_net(x, w):
    # x: (Nn, B, tK), w: (Nn, tK, O) -> (Nn, B, O)
    return jnp.einsum("nbk,nko->nbo", x, w, preferred_element_type=jnp.float32)


def _contract_shared(x, w):
    # x: (tB, tK) shared across nets, w: (Nn, tK, O) -> (Nn, tB, O)
    xb = jnp.broadcast_to(x[None, :, :], (w.shape[0],) + x.shape)
    return jnp.einsum("nbk,nko->nbo", xb, w, preferred_element_type=jnp.float32)


def _make_kernels(contract, k_axis):
    """Return (single-K kernel, multi-K kernel) for a given contraction."""

    def kernel_1k(x_ref, w_ref, b_ref, o_ref):
        prod = contract(x_ref[...], w_ref[...])
        o_ref[...] = (prod + b_ref[...]).astype(o_ref.dtype)

    def kernel_nk(x_ref, w_ref, b_ref, o_ref, *acc):
        # If no f32 scratch is passed, the (f32) resident output block itself
        # is the accumulator.
        acc_ref = acc[0] if acc else o_ref
        k = pl.program_id(k_axis)
        prod = contract(x_ref[...], w_ref[...])

        @pl.when(k == 0)
        def _():
            acc_ref[...] = prod.astype(acc_ref.dtype)

        @pl.when(k != 0)
        def _():
            acc_ref[...] += prod.astype(acc_ref.dtype)

        @pl.when(k == pl.num_programs(k_axis) - 1)
        def _():
            o_ref[...] = (acc_ref[...] + b_ref[...]).astype(o_ref.dtype)

    return kernel_1k, kernel_nk


def _compiler_params(semantics):
    return pltpu.CompilerParams(dimension_semantics=semantics,
                                vmem_limit_bytes=_VMEM_LIMIT_BYTES)


# ---------------------------------------------------------------------------
# Execution paths
# ---------------------------------------------------------------------------

def _per_net_path(x, w_nio, bias, out_dtype, tk, k_steps):
    """3-D x: per-net inputs, batched einsum, several nets per grid step."""
    n_nets, in_dim, out_dim = w_nio.shape
    batch = x.shape[1]
    itemsize = jnp.dtype(out_dtype).itemsize
    needs_scratch = (k_steps > 1) and (jnp.dtype(out_dtype) != jnp.dtype(jnp.float32))

    nn_blk = _pick_net_block(n_nets, batch, out_dim, tk, itemsize,
                             _VMEM_STEP_BUDGET, shared_x=False,
                             needs_scratch=needs_scratch, want_parallel=2)

    flops = int(2 * n_nets * batch * in_dim * out_dim)
    bytes_accessed = int(itemsize * (n_nets * batch * in_dim
                                     + n_nets * in_dim * out_dim
                                     + n_nets * out_dim
                                     + n_nets * batch * out_dim))

    kernel_1k, kernel_nk = _make_kernels(_contract_per_net, k_axis=1)

    if k_steps == 1:
        grid = (n_nets // nn_blk,)
        in_specs = [
            pl.BlockSpec((nn_blk, batch, in_dim), lambda n: (n, 0, 0)),
            pl.BlockSpec((nn_blk, in_dim, out_dim), lambda n: (n, 0, 0)),
            pl.BlockSpec((nn_blk, 1, out_dim), lambda n: (n, 0, 0)),
        ]
        out_spec = pl.BlockSpec((nn_blk, batch, out_dim), lambda n: (n, 0, 0))
        kernel, scratch, semantics = kernel_1k, [], ("parallel",)
    else:
        grid = (n_nets // nn_blk, k_steps)
        in_specs = [
            pl.BlockSpec((nn_blk, batch, tk), lambda n, k: (n, 0, k)),
            pl.BlockSpec((nn_blk, tk, out_dim), lambda n, k: (n, k, 0)),
            pl.BlockSpec((nn_blk, 1, out_dim), lambda n, k: (n, 0, 0)),
        ]
        out_spec = pl.BlockSpec((nn_blk, batch, out_dim), lambda n, k: (n, 0, 0))
        kernel = kernel_nk
        scratch = ([pltpu.VMEM((nn_blk, batch, out_dim), jnp.float32)]
                   if needs_scratch else [])
        semantics = ("parallel", "arbitrary")

    return pl.pallas_call(
        kernel,
        out_shape=jax.ShapeDtypeStruct((n_nets, batch, out_dim), out_dtype),
        grid_spec=pltpu.PrefetchScalarGridSpec(
            num_scalar_prefetch=0, grid=grid,
            in_specs=in_specs, out_specs=out_spec, scratch_shapes=scratch),
        compiler_params=_compiler_params(semantics),
        cost_estimate=pl.CostEstimate(flops=flops, transcendentals=0,
                                      bytes_accessed=bytes_accessed),
    )(x, w_nio, bias)


def _shared_nbo_path(x, w_nio, bias, out_dtype, tk, k_steps):
    """2-D x, out_dim % 128 == 0: direct (N, B, O) output, no external transpose."""
    n_nets, in_dim, out_dim = w_nio.shape
    batch = x.shape[0]
    itemsize = jnp.dtype(out_dtype).itemsize
    needs_scratch = (k_steps > 1) and (jnp.dtype(out_dtype) != jnp.dtype(jnp.float32))

    tb = _pick_batch_tile(batch)
    b_tiles = batch // tb
    want_par = 1 if b_tiles >= 2 else 2
    nn_blk = _pick_net_block(n_nets, tb, out_dim, tk, itemsize,
                             _VMEM_STEP_BUDGET, shared_x=True,
                             needs_scratch=needs_scratch, want_parallel=want_par)

    flops = int(2 * batch * in_dim * n_nets * out_dim)
    bytes_accessed = int(itemsize * (batch * in_dim + n_nets * in_dim * out_dim
                                     + n_nets * out_dim + n_nets * batch * out_dim))

    kernel_1k, kernel_nk = _make_kernels(_contract_shared, k_axis=2)

    if k_steps == 1:
        grid = (n_nets // nn_blk, b_tiles)
        in_specs = [
            pl.BlockSpec((tb, in_dim), lambda n, b: (b, 0)),
            pl.BlockSpec((nn_blk, in_dim, out_dim), lambda n, b: (n, 0, 0)),
            pl.BlockSpec((nn_blk, 1, out_dim), lambda n, b: (n, 0, 0)),
        ]
        out_spec = pl.BlockSpec((nn_blk, tb, out_dim), lambda n, b: (n, b, 0))
        kernel, scratch, semantics = kernel_1k, [], ("parallel", "parallel")
    else:
        grid = (n_nets // nn_blk, b_tiles, k_steps)
        in_specs = [
            pl.BlockSpec((tb, tk), lambda n, b, k: (b, k)),
            pl.BlockSpec((nn_blk, tk, out_dim), lambda n, b, k: (n, k, 0)),
            pl.BlockSpec((nn_blk, 1, out_dim), lambda n, b, k: (n, 0, 0)),
        ]
        out_spec = pl.BlockSpec((nn_blk, tb, out_dim), lambda n, b, k: (n, b, 0))
        kernel = kernel_nk
        scratch = ([pltpu.VMEM((nn_blk, tb, out_dim), jnp.float32)]
                   if needs_scratch else [])
        semantics = ("parallel", "parallel", "arbitrary")

    return pl.pallas_call(
        kernel,
        out_shape=jax.ShapeDtypeStruct((n_nets, batch, out_dim), out_dtype),
        grid_spec=pltpu.PrefetchScalarGridSpec(
            num_scalar_prefetch=0, grid=grid,
            in_specs=in_specs, out_specs=out_spec, scratch_shapes=scratch),
        compiler_params=_compiler_params(semantics),
        cost_estimate=pl.CostEstimate(flops=flops, transcendentals=0,
                                      bytes_accessed=bytes_accessed),
    )(x, w_nio, bias)


def _shared_fused_path(x, w_fused, b_fused, n_nets, out_dim, out_dtype, tk, k_steps):
    """2-D x, out_dim < 128 / not lane-dense: one big (B, N*O) lane-dense GEMM."""
    batch, in_dim = x.shape
    no_total = n_nets * out_dim
    itemsize = jnp.dtype(out_dtype).itemsize
    needs_scratch = (k_steps > 1) and (jnp.dtype(out_dtype) != jnp.dtype(jnp.float32))

    tb = _pick_batch_tile(batch)
    b_tiles = batch // tb
    want_par = 1 if b_tiles >= 2 else 2
    t_no = _pick_no_tile(no_total, tb, tk, itemsize, _VMEM_STEP_BUDGET,
                         needs_scratch=needs_scratch, want_parallel=want_par)
    j_tiles = no_total // t_no

    flops = int(2 * batch * in_dim * no_total)
    bytes_accessed = int(itemsize * (batch * in_dim + in_dim * no_total
                                     + no_total + batch * no_total))

    kernel_1k, kernel_nk = _make_kernels(_contract_fused, k_axis=2)

    if k_steps == 1:
        grid = (j_tiles, b_tiles)
        in_specs = [
            pl.BlockSpec((tb, in_dim), lambda j, b: (b, 0)),
            pl.BlockSpec((in_dim, t_no), lambda j, b: (0, j)),
            pl.BlockSpec((1, t_no), lambda j, b: (0, j)),
        ]
        out_spec = pl.BlockSpec((tb, t_no), lambda j, b: (b, j))
        kernel, scratch, semantics = kernel_1k, [], ("parallel", "parallel")
    else:
        grid = (j_tiles, b_tiles, k_steps)
        in_specs = [
            pl.BlockSpec((tb, tk), lambda j, b, k: (b, k)),
            pl.BlockSpec((tk, t_no), lambda j, b, k: (k, j)),
            pl.BlockSpec((1, t_no), lambda j, b, k: (0, j)),
        ]
        out_spec = pl.BlockSpec((tb, t_no), lambda j, b, k: (b, j))
        kernel = kernel_nk
        scratch = ([pltpu.VMEM((tb, t_no), jnp.float32)] if needs_scratch else [])
        semantics = ("parallel", "parallel", "arbitrary")

    out_big = pl.pallas_call(
        kernel,
        out_shape=jax.ShapeDtypeStruct((batch, no_total), out_dtype),
        grid_spec=pltpu.PrefetchScalarGridSpec(
            num_scalar_prefetch=0, grid=grid,
            in_specs=in_specs, out_specs=out_spec, scratch_shapes=scratch),
        compiler_params=_compiler_params(semantics),
        cost_estimate=pl.CostEstimate(flops=flops, transcendentals=0,
                                      bytes_accessed=bytes_accessed),
    )(x, w_fused, b_fused)
    # (B, N*O) -> (N, B, O); only taken when out_dim is not a multiple of 128,
    # where masked-store avoidance inside the kernel outweighs this plumbing.
    return jnp.transpose(out_big.reshape(batch, n_nets, out_dim), (1, 0, 2))


# ---------------------------------------------------------------------------
# Public API
# ---------------------------------------------------------------------------

def prepare_linear_mult_params(weights, bias):
    """One-time weight re-layout (hoisted out of the hot path).

    weights: (N, O, I) torch layout; bias: (N, 1, O).
    """
    n_nets, out_dim, in_dim = weights.shape
    params = {
        "n_nets": n_nets, "out_dim": out_dim, "in_dim": in_dim,
        "w_nio": jnp.transpose(weights, (0, 2, 1)),   # (N, I, O) MXU-friendly
        "bias": bias,
    }
    if out_dim % 128 != 0:
        # Fused lane layout only needed for the 2-D shared-input path when
        # out_dim alone is not lane-dense.
        params["w_fused"] = jnp.transpose(weights, (2, 0, 1)).reshape(in_dim,
                                                                      n_nets * out_dim)
        params["bias_fused"] = bias.reshape(1, n_nets * out_dim)
    return params


def linear_mult_prepared(x, params):
    """Pallas LinearMult.forward with pre-laid-out weights.

    x: (B, I) or (N, B, I); returns (N, B, O).
    """
    n_nets = params["n_nets"]
    out_dim = params["out_dim"]
    in_dim = params["in_dim"]
    w_nio = params["w_nio"]
    bias = params["bias"]

    out_dtype = jnp.result_type(x.dtype, w_nio.dtype)
    tk = _pick_k_tile(in_dim, _VMEM_STEP_BUDGET)
    k_steps = in_dim // tk

    if x.ndim == 3:
        return _per_net_path(x, w_nio, bias, out_dtype, tk, k_steps)

    # 2-D shared input.
    if out_dim % 128 == 0:
        return _shared_nbo_path(x, w_nio, bias, out_dtype, tk, k_steps)

    w_fused = params.get("w_fused")
    b_fused = params.get("bias_fused")
    if w_fused is None:  # fallback if caller skipped preparing the fused layout
        w_fused = jnp.transpose(w_nio, (1, 0, 2)).reshape(in_dim, n_nets * out_dim)
        b_fused = bias.reshape(1, n_nets * out_dim)
    return _shared_fused_path(x, w_fused, b_fused, n_nets, out_dim,
                              out_dtype, tk, k_steps)


def linear_mult(x, weights, bias):
    """Convenience wrapper taking torch-layout (N, O, I) weights.

    Note: re-layouts weights every call; prefer prepare_linear_mult_params()
    + linear_mult_prepared() when weights are reused across calls.
    """
    return linear_mult_prepared(x, prepare_linear_mult_params(weights, bias))


# ---------------------------------------------------------------------------
# Init (matches LinearMult.init_weights) and reference
# ---------------------------------------------------------------------------

def init_linear_mult_params(key, in_dim, out_dim, n_nets):
    """gain(leaky_relu, sqrt(5)) = sqrt(1/3); w_bound = sqrt(3)*gain/sqrt(in_dim)."""
    kw, kb = jax.random.split(key)
    gain = math.sqrt(2.0 / (1.0 + 5.0))
    w_bound = math.sqrt(3.0) * gain / math.sqrt(in_dim)
    b_bound = 1.0 / math.sqrt(in_dim)
    weights = jax.random.uniform(
        kw, (n_nets, out_dim, in_dim), jnp.float32, -w_bound, w_bound)
    bias = jax.random.uniform(
        kb, (n_nets, 1, out_dim), jnp.float32, -b_bound, b_bound)
    return weights, bias


def _reference(x, weights, bias):
    eq = 'bi,noi->nbo' if x.ndim == 2 else 'nbi,noi->nbo'
    return jnp.einsum(eq, x, weights,
                      precision=jax.lax.Precision.HIGHEST) + bias


# ---------------------------------------------------------------------------
# Test
# ---------------------------------------------------------------------------

if __name__ == "__main__":
    key = jax.random.PRNGKey(0)

    def _check(n_nets, batch, in_dim, out_dim, k):
        kp, k3, k2 = jax.random.split(k, 3)
        weights, bias = init_linear_mult_params(kp, in_dim, out_dim, n_nets)
        params = prepare_linear_mult_params(weights, bias)  # one-time layout

        # 3-D input: per-net inputs  (nbi,noi->nbo)
        x3 = jax.random.normal(k3, (n_nets, batch, in_dim), jnp.float32)
        y3 = jax.block_until_ready(linear_mult_prepared(x3, params))
        assert y3.shape == (n_nets, batch, out_dim)
        assert jnp.allclose(y3, _reference(x3, weights, bias),
                            atol=1e-3, rtol=1e-3)

        # 2-D input: shared input broadcast over nets  (bi,noi->nbo)
        x2 = jax.random.normal(k2, (batch, in_dim), jnp.float32)
        y2 = jax.block_until_ready(linear_mult_prepared(x2, params))
        assert y2.shape == (n_nets, batch, out_dim)
        assert jnp.allclose(y2, _reference(x2, weights, bias),
                            atol=1e-3, rtol=1e-3)

    k1, k2 = jax.random.split(key)
    # Small case: single-K path, fused lane-dense 2-D path (out_dim < 128).
    _check(n_nets=4, batch=8, in_dim=32, out_dim=16, k=k1)
    # Moderate case: K tiling (tk=128, 2 steps), direct (N,B,O) 2-D path
    # (out_dim % 128 == 0), f32 output accumulated in-place (no scratch).
    _check(n_nets=4, batch=16, in_dim=256, out_dim=128, k=k2)

    print("KERNEL_OK")
</pallas_src>

<mosaic_0001>
module attributes {stable_mosaic.version = 11 : i64} {
  func.func @kernel_1k(%arg0: i32, %arg1: memref<2x8x32xf32, #tpu.memory_space<vmem>>, %arg2: memref<2x32x16xf32, #tpu.memory_space<vmem>>, %arg3: memref<2x1x16xf32, #tpu.memory_space<vmem>>, %arg4: memref<2x8x16xf32, #tpu.memory_space<vmem>>) attributes {dimension_semantics = [#tpu.dimension_semantics<parallel>], iteration_bounds = array<i64: 2>, scalar_prefetch = 0 : i64, scratch_operands = 0 : i64, tpu.core_type = #tpu.core_type<tc>, window_params = [{transform_indices = @transform_0, window_bounds = array<i64: 2, 8, 32>}, {transform_indices = @transform_1, window_bounds = array<i64: 2, 32, 16>}, {transform_indices = @transform_2, window_bounds = array<i64: 2, 1, 16>}, {transform_indices = @transform_3, window_bounds = array<i64: 2, 8, 16>}]} {
    %c0 = arith.constant 0 : index
    %c0_0 = arith.constant 0 : index
    %c0_1 = arith.constant 0 : index
    %0 = vector.load %arg1[%c0, %c0_0, %c0_1] : memref<2x8x32xf32, #tpu.memory_space<vmem>>, vector<2x8x32xf32>
    %c0_2 = arith.constant 0 : index
    %c0_3 = arith.constant 0 : index
    %c0_4 = arith.constant 0 : index
    %1 = vector.load %arg2[%c0_2, %c0_3, %c0_4] : memref<2x32x16xf32, #tpu.memory_space<vmem>>, vector<2x32x16xf32>
    "tpu.trace_start"() <{level = 10 : i32, message = "nbk,nko->nbo"}> : () -> ()
    %cst = arith.constant dense<0.000000e+00> : vector<2x8x16xf32>
    %2 = tpu.matmul %0, %1, %cst {dimension_numbers = #tpu.dot_dimension_numbers<[2], [1], [1], [2], [0, 0, 0, 1, 1, 2], [0], [0]>} : vector<2x8x32xf32>, vector<2x32x16xf32>, vector<2x8x16xf32> -> vector<2x8x16xf32>
    "tpu.trace_stop"() : () -> ()
    %c0_5 = arith.constant 0 : index
    %c0_6 = arith.constant 0 : index
    %c0_7 = arith.constant 0 : index
    %3 = vector.load %arg3[%c0_5, %c0_6, %c0_7] : memref<2x1x16xf32, #tpu.memory_space<vmem>>, vector<2x1x16xf32>
    %4 = vector.broadcast %3 : vector<2x1x16xf32> to vector<2x8x16xf32>
    %5 = arith.addf %2, %4 : vector<2x8x16xf32>
    %c0_8 = arith.constant 0 : index
    %c0_9 = arith.constant 0 : index
    %c0_10 = arith.constant 0 : index
    %6 = vector.load %arg4[%c0_8, %c0_9, %c0_10] : memref<2x8x16xf32, #tpu.memory_space<vmem>>, vector<2x8x16xf32>
    tpu.vector_store %arg4[%c0_8, %c0_9, %c0_10], %5 {strides = array<i32>} : memref<2x8x16xf32, #tpu.memory_space<vmem>>, vector<2x8x16xf32>,
    return
  }
  func.func @transform_0(%arg0: i32) -> (i32, i32, i32) {
    %c0_i32 = arith.constant 0 : i32
    %c0_i32_0 = arith.constant 0 : i32
    %c0_i32_1 = arith.constant 0 : i32
    return %arg0, %c0_i32, %c0_i32_0 : i32, i32, i32
  }
  func.func @transform_1(%arg0: i32) -> (i32, i32, i32) {
    %c0_i32 = arith.constant 0 : i32
    %c0_i32_0 = arith.constant 0 : i32
    %c0_i32_1 = arith.constant 0 : i32
    return %arg0, %c0_i32, %c0_i32_0 : i32, i32, i32
  }
  func.func @transform_2(%arg0: i32) -> (i32, i32, i32) {
    %c0_i32 = arith.constant 0 : i32
    %c0_i32_0 = arith.constant 0 : i32
    %c0_i32_1 = arith.constant 0 : i32
    return %arg0, %c0_i32, %c0_i32_0 : i32, i32, i32
  }
  func.func @transform_3(%arg0: i32) -> (i32, i32, i32) {
    %c0_i32 = arith.constant 0 : i32
    %c0_i32_0 = arith.constant 0 : i32
    %c0_i32_1 = arith.constant 0 : i32
    return %arg0, %c0_i32, %c0_i32_0 : i32, i32, i32
  }
}

</mosaic_0001>

<bundles_post_ra>
// kernel: tpu_custom_call.1
= control target key start
LH: loop header
LB: loop body
LE: loop exit
PB: predicated region body
PF: predicated region fallthrough
CT: control target
= control target key end

     0   :  { %8 = vsyncpa [#allocation3], 0  ;;  %s622_s0 = inlined_call_operand.vmem [shape: f32[4,8,32], index: 0, kind: input, shape index: {}]   ;;  %s623_s1 = inlined_call_operand.vmem [shape: f32[4,32,16], index: 1, kind: input, shape index: {}]   ;;  %s624_s2 = inlined_call_operand.vmem [shape: f32[4,1,16], index: 2, kind: input, shape index: {}]   ;;  %s625_s3 = inlined_call_operand.hbm [shape: f32[4,8,16], index: 3, kind: output, shape index: {}]  }
   0x1   :  { %10 = vsyncpa [#allocation3 + $0x1], 0  ;;  %s532_s12 = smov 0   ;;  %s534_s13 = smov 0  }
   0x2   :  { %s536_s14 = smov 0   ;;  %s538_s15 = smov 0  }
   0x3 LB: > { %s553_s16 = sadd.s32 4294967295, %s508_s15   ;;  %s383_s17 = sadd.s32 4294967294, %s508_s15   ;;  %s508_s15 = sphi %s538_s15, %s631_s15   ;;  %s504_s14 = sphi %s536_s14, %s630_s14   ;;  %s500_s13 = sphi %s534_s13, %s629_s13   ;;  %s496_s12 = sphi %s532_s12, %s628_s12  }
   0x4   : > { %s557_s18 = sadd.s32 1, %s508_s15   ;;  %s101_s19 = sadd.s32 1, %s504_s14 }
   0x5   : > { %s98_s20 = ssub.s32 %s508_s15, %s557_s18  ;;  %p111_p0 = scmp.ne.s32.totalorder %s504_s14, %s500_s13 }
   0x6   : > { %p99_p1 = scmp.eq.s32.totalorder %s98_s20, 0  ;;  %p112_p2 = scmp.eq.s32.totalorder %s553_s16, 1 }
   0x7   : > { %p117_p3 = scmp.ne.s32.totalorder %s500_s13, %s496_s12  ;;  %p118_p4 = scmp.eq.s32.totalorder %s383_s17, 1 }
   0x8   : > { %s568_s21 = scalar_select %p99_p1, %s504_s14, %s101_s19  }
   0x9   : > { %p570_p5 = por %p112_p2, %p111_p0  ;;  %p574_p6 = por %p118_p4, %p117_p3 }
   0xa   : > { %p386_p7 = scmp.ge.s32.totalorder %s508_s15, 1  ;;  %p163_p8 = scmp.lt.s32.totalorder %s508_s15, 3 }
   0xc   : > { %p164_p9 = pnand %p386_p7, %p163_p8 }
   0xd   : > { %s388_s24 = sshll.u32 (!%p164_p9), %s553_s16, 1  ;;  %s194_s9 = sand.u32 (!%p164_p9), 1, %s500_s13  }
   0xe   : > { %167 = sbr.rel (%p164_p9) target bundleno = 163 (0xa3), region = 32  ;;  %p198_p10 = scmp.lt.s32.totalorder (!%p164_p9), %s388_s24, 3 }
   0xf   : > { %s387_s10 = sshll.u32 (!%p164_p9), %s194_s9, 4  ;;  %s402_s11 = sshll.u32 (!%p164_p9), %s553_s16, 4 }
  0x10   : > { %s296_s20 = scalar_lea.hbm (!%p164_p9), %s625_s3, %s402_s11  ;;  %s285_s16 = scalar_lea.sflag (!%p164_p9), [#allocation3], %s194_s9 }
  0x11   : > { %s299_s26 = sshll.u32 (!%p164_p9), %s296_s20, 4  ;;  %s466_s4 = scalar_lea.hbm (!%p164_p9), %s625_s3, 32  ;;  %s300_s26 = int_to_ptr.hbm [resolvable:$true] %s299_s26 }
  0x12   : > { %s460_s27 = sshra.s32 (!%p164_p9), %s300_s26, 4  ;;  %s461_s27 = int_to_ptr.hbm [resolvable:$true] %s460_s27 }
  0x13   : > { %s633_s24 = smov (!%p198_p10, %s388_s24), 3  ;;  %vm234_vm0 = vcmask 261120   ;;  %vm281_vm1 = vcmask 130048   ;;  %p467_p0 = scmp.lt.s32.totalorder %s461_s27, %s625_s3 }
  0x14   : > { %s401_s25 = sshll.u32 %s633_s24, 5  ;;  %s389_s29 = sshll.u32 %s633_s24, 3 }
  0x15   : > { %s208_s28 = scalar_lea.vmem %s623_s1, %s401_s25  ;;  %s201_s5 = scalar_lea.vmem %s622_s0, %s389_s29 }
  0x16   : > { %v221_v0 = vld [vmem:[%s208_s28 + $0x18] sm:$0xff]  ;;  %v220_v2 = vld [vmem:[%s208_s28 + $0x10] sm:$0xff]  ;;  %v219_v4 = vld [vmem:[%s208_s28 + $0x8] sm:$0xff]  ;;  %s213_s8 = scalar_lea.vmem %s624_s2, %s633_s24  ;;  %s196_s24 = scalar_lea.vmem [#allocation2], %s387_s10 }
  0x17   : > { %v225_v1 = vld [vmem:[%s208_s28 + $0x38] sm:$0xff]  ;;  %250 = vmatpush.msra.mxu0 %v221_v0  ;;  %v224_v3 = vld [vmem:[%s208_s28 + $0x30] sm:$0xff]  ;;  %v223_v5 = vld [vmem:[%s208_s28 + $0x28] sm:$0xff]  ;;  %s297_s25 = sshll.u32 %s196_s24, 4  ;;  %s298_s25 = int_to_ptr.vmem [resolvable:$true] %s297_s25 }
  0x18   : > { %273 = vmatpush.msra.mxu1 %v225_v1  ;;  %v218_v6 = vld [vmem:[%s208_s28] sm:$0xff]  ;;  %v217_v9 = vld [vmem:[%s201_s5 + $0x8] sm:$0xff] }
  0x19   : > { %251 = vmatpush.msra.mxu0 %v220_v2  ;;  %v222_v7 = vld [vmem:[%s208_s28 + $0x20] sm:$0xff]  ;;  %s462_s28 = scalar_lea.hbm %s461_s27, 16 }
  0x1a   : > { %274 = vmatpush.msra.mxu1 %v224_v3  ;;  %v216_v8 = vld [vmem:[%s201_s5] sm:$0xff]  ;;  %p463_p11 = scmp.ne.s32.totalorder %s461_s27, %s462_s28  ;;  %p468_p1 = scmp.lt.s32.totalorder %s466_s4, %s462_s28 }
  0x1b   : > { %252 = vmatpush.msra.mxu0 %v219_v4  ;;  %v444_v10 = vld [vmem:[%s213_s8] ss:$0 sm:$0xff]  ;;  %v445_v11 = vld [vmem:[%s213_s8 + $0x1] ss:$0 sm:$0xff] }
  0x1c   : > { %275 = vmatpush.msra.mxu1 %v223_v5  ;;  %p464_p12 = pnand %p463_p11, %p570_p5  ;;  %p469_p2 = por %p468_p1, %p467_p0 }
  0x1d   : > { %253 = vmatpush.msra.mxu0 %v218_v6 }
  0x1e   : > { %276 = vmatpush.msra.mxu1 %v222_v7  ;;  %394 = vmatmul.msk.f32.vlgmr.msra.gmra.mxu0 %vm234_vm0, %v216_v8  ;;  %p465_p13 = pneg %p464_p12 }
  0x1f   : > { %395 = vmatmul.msk.f32.vlgmr.msra.gmra.mxu1 %vm234_vm0, %v217_v9 }
  0x20   : > { %p470_p3 = pnand %p469_p2, %p465_p13 }
  0x9b   : > { %v255_v12 = vpop.f32.mrf.mxu0 }
  0x9c   : > { %v278_v13 = vpop.f32.mrf.mxu1  ;;  %v256_v14 = vadd.f32 %v444_v10, %v255_v12 }
  0x9d   : > { %v279_v15 = vadd.f32 %v445_v11, %v278_v13 }
  0x9e   : > { %282 = vst.msk [vmem:[%s196_s24] sm:$0xff] %vm281_vm1, %v256_v14 }
  0x9f   : > { %283 = vst.msk [vmem:[%s196_s24 + $0x8] sm:$0xff] %vm281_vm1, %v279_v15 }
  0xa0   : > { %473 = shalt.err (!%p470_p3)
}
  0xa1   : > { %s510_s7 = smov 128   ;;  %s511_s8 = smov 8  }
  0xa2   : > { %403 = dma.vmem_to_hbm [thread:$0]  (%p570_p5), %s298_s25, 256, %s300_s26, %s285_s16, %s510_s7, %s510_s7, %s511_s8  }
  0xa3 PF: > { %p409_p4 = scmp.ge.s32.totalorder %s508_s15, 2  ;;  %s314_s9 = sand.u32 1, %s496_s12  }
  0xa4   : > { %s315_s10 = scalar_lea.sflag [#allocation3], %s314_s9 }
  0xa5   : > { %p406_p7 = pnand %p409_p4, %p574_p6 }
  0xa7   : > { %p407_p8 = pneg %p406_p7 }
  0xa9   : > { %491 = dma.done.wait (%p407_p8), %s315_s10, 256  }
  0xaa   : > { %493 = vsyncadd (%p407_p8), %s315_s10, 4294967040  ;;  %p13_p9 = scmp.ge.s32.totalorder %s557_s18, 4   ;;  %s628_s12 = smov %s500_s13 }
  0xab   : > { %s629_s13 = smov %s504_s14  ;;  %s630_s14 = smov %s568_s21 }
  0xac   : > { %s631_s15 = smov %s557_s18  ;;  %15 = sbr.rel (!%p13_p9) target bundleno = 3 (0x3), region = 73 }
  0xb1   :  { %321 = vsyncpa [#allocation3], 1 }
  0xb2   :  { %323 = vsyncpa [#allocation3 + $0x1], 1 }

</bundles_post_ra>
